<compile_context>
chip_gen: v7x
topology: tpu7x:2x2x1
jax: 0.10.0
libtpu: 0.0.40
codegen_flags: <defaults>
</compile_context>

<pallas_src>
import jax
import jax.numpy as jnp
import numpy as np
from jax import lax
from jax.experimental import pallas as pl
from jax.experimental.pallas import tpu as pltpu

BN_EPS = 1e-5


# ------------------------------- kernels -----------------------------------
def _conv_row_kernel(xrow_ref, bw_ref, y_ref, st_ref):
    """3x3 conv over one batch element, lane-dense row layout.

    xrow_ref : (1, H+2, W*Cin)   H-padded, (W,C)-fused rows
    bw_ref   : (3, W*Cin, W*Cout) block-tridiagonal row weights (dy = 0,1,2)
    y_ref    : (1, H, W*Cout)     pre-BN conv output (f32)
    st_ref   : (1, 2, W*Cout)     per-tile [sum ; sum of squares] over H
    """
    H = y_ref.shape[1]
    x = xrow_ref[0]                                    # (H+2, W*Cin)
    acc = jnp.dot(x[0:H, :], bw_ref[0], preferred_element_type=jnp.float32)
    acc += jnp.dot(x[1:H + 1, :], bw_ref[1], preferred_element_type=jnp.float32)
    acc += jnp.dot(x[2:H + 2, :], bw_ref[2], preferred_element_type=jnp.float32)
    # (conv bias omitted: cancelled exactly by training-mode BN)
    y_ref[0] = acc
    st_ref[0, 0:1, :] = jnp.sum(acc, axis=0, keepdims=True)
    st_ref[0, 1:2, :] = jnp.sum(acc * acc, axis=0, keepdims=True)


def _bn_relu_conv_row_kernel(y1_ref, sc_ref, sh_ref, bw_ref, y2_ref, st_ref,
                             hrow_ref):
    """Folded BN1 + ReLU + 3x3 conv2 (+ per-tile stats) for one batch element."""
    H, WC = y1_ref.shape[1], y1_ref.shape[2]
    # bn1 folded into per-lane scale/shift (tiled per channel) + relu, lane-dense
    h1 = jnp.maximum(y1_ref[0] * sc_ref[...] + sh_ref[...], 0.0)   # (H, WC)

    # H-padded row buffer for conv2; zero only the two halo rows (aligned,
    # full-lane-width stores).
    hrow_ref[0:1, :] = jnp.zeros((1, WC), jnp.float32)
    hrow_ref[H + 1:H + 2, :] = jnp.zeros((1, WC), jnp.float32)
    hrow_ref[1:H + 1, :] = h1
    hp = hrow_ref[...]

    acc = jnp.dot(hp[0:H, :], bw_ref[0], preferred_element_type=jnp.float32)
    acc += jnp.dot(hp[1:H + 1, :], bw_ref[1], preferred_element_type=jnp.float32)
    acc += jnp.dot(hp[2:H + 2, :], bw_ref[2], preferred_element_type=jnp.float32)
    y2_ref[0] = acc
    st_ref[0, 0:1, :] = jnp.sum(acc, axis=0, keepdims=True)
    st_ref[0, 1:2, :] = jnp.sum(acc * acc, axis=0, keepdims=True)


def _bn_add_relu_kernel(y2_ref, x_ref, sc_ref, sh_ref, out_ref):
    """Folded BN2 + residual add + ReLU, fully elementwise and lane-dense."""
    res = y2_ref[0] * sc_ref[...] + sh_ref[...] + x_ref[0].astype(jnp.float32)
    out_ref[0] = jnp.maximum(res, 0.0).astype(out_ref.dtype)


# ------------------------------- wrapper ------------------------------------
def _band_weights(w_oihw, W):
    """OIHW 3x3 conv weights -> (3, W*Cin, W*Cout) block-tridiagonal row matrices.

    BW[dy][(w+dx-1)*Cin + ci, w*Cout + co] = w_oihw[co, ci, dy, dx]
    (entries with w+dx-1 outside [0, W) are zero == implicit W zero-padding).
    """
    Cout, Cin, KH, KW = w_oihw.shape
    taps = jnp.transpose(w_oihw, (2, 3, 1, 0)).astype(jnp.float32)  # (3,3,Cin,Cout)
    bws = []
    for dy in range(KH):
        blocks = jnp.zeros((W, W, Cin, Cout), jnp.float32)  # [input col, output col]
        for dx in range(KW):
            w_idx = np.arange(W)
            i_idx = w_idx + dx - 1
            m = (i_idx >= 0) & (i_idx < W)
            blocks = blocks.at[i_idx[m], w_idx[m]].set(taps[dy, dx])
        bw = jnp.transpose(blocks, (0, 2, 1, 3)).reshape(W * Cin, W * Cout)
        bws.append(bw)
    return jnp.stack(bws)


def _folded_bn_params(stats, gamma, beta, count, W, C):
    """Per-tile (N, 2, W*C) sums -> lane-tiled BN scale/shift of shape (1, W*C)."""
    s = stats.sum(axis=0).reshape(2, W, C).sum(axis=1)          # (2, C)
    mean = s[0] / count
    var = s[1] / count - mean * mean                             # biased variance
    scale = gamma.astype(jnp.float32) * lax.rsqrt(var + BN_EPS)
    shift = beta.astype(jnp.float32) - mean * scale
    return (jnp.tile(scale, W).reshape(1, W * C),
            jnp.tile(shift, W).reshape(1, W * C))


def residual_block_pallas(x_nhwc, w1_oihw, b1, g1, be1, w2_oihw, b2, g2, be2):
    """x_nhwc: (N, H, W, C); conv weights in PyTorch OIHW layout.

    b1/b2 are accepted for interface parity but are mathematically cancelled by
    the training-mode BatchNorm that immediately follows each conv.
    """
    del b1, b2
    N, H, W, C = x_nhwc.shape
    Cout = w1_oihw.shape[0]
    assert Cout == C, "identity shortcut requires in_channels == out_channels"
    WC = W * C
    dtype = x_nhwc.dtype

    # Lane-dense packed layouts: trailing dim = W*C (128 for the test shape).
    x_rows = x_nhwc.reshape(N, H, WC)
    xpad_rows = jnp.pad(x_rows, ((0, 0), (1, 1), (0, 0)))        # H-halo only

    bw1 = _band_weights(w1_oihw, W).astype(dtype)
    bw2 = _band_weights(w2_oihw, W)                              # conv2 input is f32

    cp = pltpu.CompilerParams(dimension_semantics=("parallel",),
                              vmem_limit_bytes=32 * 1024 * 1024)

    row_spec = pl.BlockSpec((1, H, WC), lambda n: (n, 0, 0))
    padrow_spec = pl.BlockSpec((1, H + 2, WC), lambda n: (n, 0, 0))
    w_spec = pl.BlockSpec((3, WC, WC), lambda n: (0, 0, 0))
    vec_spec = pl.BlockSpec((1, WC), lambda n: (0, 0))
    st_spec = pl.BlockSpec((1, 2, WC), lambda n: (n, 0, 0))

    # ---- pass 1: conv1 + per-tile stats ----
    y1, st1 = pl.pallas_call(
        _conv_row_kernel,
        grid=(N,),
        in_specs=[padrow_spec, w_spec],
        out_specs=[row_spec, st_spec],
        out_shape=[jax.ShapeDtypeStruct((N, H, WC), jnp.float32),
                   jax.ShapeDtypeStruct((N, 2, WC), jnp.float32)],
        compiler_params=cp,
    )(xpad_rows, bw1)

    sc1, sh1 = _folded_bn_params(st1, g1, be1, N * H * W, W, C)

    # ---- pass 2: bn1 + relu + conv2 + per-tile stats ----
    y2, st2 = pl.pallas_call(
        _bn_relu_conv_row_kernel,
        grid=(N,),
        in_specs=[row_spec, vec_spec, vec_spec, w_spec],
        out_specs=[row_spec, st_spec],
        out_shape=[jax.ShapeDtypeStruct((N, H, WC), jnp.float32),
                   jax.ShapeDtypeStruct((N, 2, WC), jnp.float32)],
        scratch_shapes=[pltpu.VMEM((H + 2, WC), jnp.float32)],
        compiler_params=cp,
    )(y1, sc1, sh1, bw2)

    sc2, sh2 = _folded_bn_params(st2, g2, be2, N * H * W, W, C)

    # ---- pass 3: bn2 + residual add + relu ----
    out_rows = pl.pallas_call(
        _bn_add_relu_kernel,
        grid=(N,),
        in_specs=[row_spec, row_spec, vec_spec, vec_spec],
        out_specs=row_spec,
        out_shape=jax.ShapeDtypeStruct((N, H, WC), dtype),
        compiler_params=cp,
    )(y2, x_rows, sc2, sh2)

    return out_rows.reshape(N, H, W, C)


# ------------------- pure-JAX reference (for verification) ------------------
def _bn_train(x, gamma, beta):
    m = jnp.mean(x, axis=(0, 1, 2), keepdims=True)
    v = jnp.mean((x - m) ** 2, axis=(0, 1, 2), keepdims=True)   # biased variance
    return (x - m) * lax.rsqrt(v + BN_EPS) * gamma + beta


def residual_block_ref(x_nhwc, w1_oihw, b1, g1, be1, w2_oihw, b2, g2, be2):
    dn = ('NHWC', 'HWIO', 'NHWC')
    hp = lax.Precision.HIGHEST
    w1_hwio = jnp.transpose(w1_oihw, (2, 3, 1, 0))
    w2_hwio = jnp.transpose(w2_oihw, (2, 3, 1, 0))
    out = lax.conv_general_dilated(x_nhwc, w1_hwio, (1, 1), ((1, 1), (1, 1)),
                                   dimension_numbers=dn, precision=hp) + b1
    out = jnp.maximum(_bn_train(out, g1, be1), 0.0)
    out = lax.conv_general_dilated(out, w2_hwio, (1, 1), ((1, 1), (1, 1)),
                                   dimension_numbers=dn, precision=hp) + b2
    out = _bn_train(out, g2, be2)
    return jnp.maximum(out + x_nhwc, 0.0)


if __name__ == "__main__":
    N, C, H, W = 2, 8, 16, 16   # identity shortcut: in_channels == out_channels
    key = jax.random.PRNGKey(0)
    ks = jax.random.split(key, 9)

    x_nchw = jax.random.normal(ks[0], (N, C, H, W), jnp.float32)      # PyTorch layout
    w1 = jax.random.normal(ks[1], (C, C, 3, 3), jnp.float32) * 0.1    # OIHW
    b1 = jax.random.normal(ks[2], (C,), jnp.float32) * 0.1
    w2 = jax.random.normal(ks[3], (C, C, 3, 3), jnp.float32) * 0.1
    b2 = jax.random.normal(ks[4], (C,), jnp.float32) * 0.1
    g1 = 1.0 + 0.1 * jax.random.normal(ks[5], (C,), jnp.float32)
    be1 = 0.1 * jax.random.normal(ks[6], (C,), jnp.float32)
    g2 = 1.0 + 0.1 * jax.random.normal(ks[7], (C,), jnp.float32)
    be2 = 0.1 * jax.random.normal(ks[8], (C,), jnp.float32)

    # NCHW (PyTorch) -> NHWC (kernel layout)
    x_nhwc = jnp.transpose(x_nchw, (0, 2, 3, 1))

    run = jax.jit(residual_block_pallas)
    out = jax.block_until_ready(
        run(x_nhwc, w1, b1, g1, be1, w2, b2, g2, be2))

    ref = residual_block_ref(x_nhwc, w1, b1, g1, be1, w2, b2, g2, be2)
    assert out.shape == (N, H, W, C)
    err = float(jnp.max(jnp.abs(out - ref)))
    assert jnp.allclose(out, ref, atol=5e-4, rtol=5e-4), f"max abs err {err}"

    print("KERNEL_OK")
</pallas_src>

<mosaic_0001>
module attributes {stable_mosaic.version = 11 : i64} {
  func.func @_conv_row_kernel(%arg0: i32, %arg1: memref<1x18x128xf32, #tpu.memory_space<vmem>>, %arg2: memref<3x128x128xf32, #tpu.memory_space<vmem>>, %arg3: memref<1x16x128xf32, #tpu.memory_space<vmem>>, %arg4: memref<1x2x128xf32, #tpu.memory_space<vmem>>) attributes {dimension_semantics = [#tpu.dimension_semantics<parallel>], iteration_bounds = array<i64: 2>, scalar_prefetch = 0 : i64, scratch_operands = 0 : i64, tpu.core_type = #tpu.core_type<tc>, window_params = [{transform_indices = @transform_0, window_bounds = array<i64: 1, 18, 128>}, {pipeline_mode = #tpu.pipeline_mode<synchronous>, transform_indices = @transform_1, window_bounds = array<i64: 3, 128, 128>}, {transform_indices = @transform_2, window_bounds = array<i64: 1, 16, 128>}, {transform_indices = @transform_3, window_bounds = array<i64: 1, 2, 128>}]} {
    %c0 = arith.constant 0 : index
    %c0_0 = arith.constant 0 : index
    %c0_1 = arith.constant 0 : index
    %0 = vector.load %arg1[%c0, %c0_0, %c0_1] : memref<1x18x128xf32, #tpu.memory_space<vmem>>, vector<1x18x128xf32>
    %1 = vector.shape_cast %0 : vector<1x18x128xf32> to vector<18x128xf32>
    %2 = vector.extract_strided_slice %1 {offsets = [0, 0], sizes = [16, 128], strides = [1, 1]} : vector<18x128xf32> to vector<16x128xf32>
    %c0_2 = arith.constant 0 : index
    %c0_3 = arith.constant 0 : index
    %c0_4 = arith.constant 0 : index
    %3 = vector.load %arg2[%c0_2, %c0_3, %c0_4] : memref<3x128x128xf32, #tpu.memory_space<vmem>>, vector<1x128x128xf32>
    %4 = vector.shape_cast %3 : vector<1x128x128xf32> to vector<128x128xf32>
    %cst = arith.constant dense<0.000000e+00> : vector<16x128xf32>
    %5 = tpu.matmul %2, %4, %cst {dimension_numbers = #tpu.dot_dimension_numbers<[1], [0], [0], [1], [0, 0, 1, 1], [], []>} : vector<16x128xf32>, vector<128x128xf32>, vector<16x128xf32> -> vector<16x128xf32>
    %6 = vector.extract_strided_slice %1 {offsets = [1, 0], sizes = [16, 128], strides = [1, 1]} : vector<18x128xf32> to vector<16x128xf32>
    %c1 = arith.constant 1 : index
    %c0_5 = arith.constant 0 : index
    %c0_6 = arith.constant 0 : index
    %7 = vector.load %arg2[%c1, %c0_5, %c0_6] : memref<3x128x128xf32, #tpu.memory_space<vmem>>, vector<1x128x128xf32>
    %8 = vector.shape_cast %7 : vector<1x128x128xf32> to vector<128x128xf32>
    %cst_7 = arith.constant dense<0.000000e+00> : vector<16x128xf32>
    %9 = tpu.matmul %6, %8, %cst_7 {dimension_numbers = #tpu.dot_dimension_numbers<[1], [0], [0], [1], [0, 0, 1, 1], [], []>} : vector<16x128xf32>, vector<128x128xf32>, vector<16x128xf32> -> vector<16x128xf32>
    %10 = arith.addf %5, %9 : vector<16x128xf32>
    %11 = vector.extract_strided_slice %1 {offsets = [2, 0], sizes = [16, 128], strides = [1, 1]} : vector<18x128xf32> to vector<16x128xf32>
    %c2 = arith.constant 2 : index
    %c0_8 = arith.constant 0 : index
    %c0_9 = arith.constant 0 : index
    %12 = vector.load %arg2[%c2, %c0_8, %c0_9] : memref<3x128x128xf32, #tpu.memory_space<vmem>>, vector<1x128x128xf32>
    %13 = vector.shape_cast %12 : vector<1x128x128xf32> to vector<128x128xf32>
    %cst_10 = arith.constant dense<0.000000e+00> : vector<16x128xf32>
    %14 = tpu.matmul %11, %13, %cst_10 {dimension_numbers = #tpu.dot_dimension_numbers<[1], [0], [0], [1], [0, 0, 1, 1], [], []>} : vector<16x128xf32>, vector<128x128xf32>, vector<16x128xf32> -> vector<16x128xf32>
    %15 = arith.addf %10, %14 : vector<16x128xf32>
    %c0_11 = arith.constant 0 : index
    %c0_12 = arith.constant 0 : index
    %c0_13 = arith.constant 0 : index
    %16 = vector.load %arg3[%c0_11, %c0_12, %c0_13] : memref<1x16x128xf32, #tpu.memory_space<vmem>>, vector<1x16x128xf32>
    %17 = vector.shape_cast %16 : vector<1x16x128xf32> to vector<16x128xf32>
    %18 = vector.shape_cast %15 : vector<16x128xf32> to vector<1x16x128xf32>
    tpu.vector_store %arg3[%c0_11, %c0_12, %c0_13], %18 {strides = array<i32>} : memref<1x16x128xf32, #tpu.memory_space<vmem>>, vector<1x16x128xf32>,
    %cst_14 = arith.constant dense<0.000000e+00> : vector<128xf32>
    %19 = vector.multi_reduction <add>, %15, %cst_14 [0] : vector<16x128xf32> to vector<128xf32>
    %20 = vector.shape_cast %19 : vector<128xf32> to vector<1x128xf32>
    %c0_15 = arith.constant 0 : index
    %c0_16 = arith.constant 0 : index
    %c0_17 = arith.constant 0 : index
    %21 = vector.load %arg4[%c0_15, %c0_16, %c0_17] : memref<1x2x128xf32, #tpu.memory_space<vmem>>, vector<1x1x128xf32>
    %22 = vector.shape_cast %21 : vector<1x1x128xf32> to vector<1x128xf32>
    %23 = vector.shape_cast %20 : vector<1x128xf32> to vector<1x1x128xf32>
    tpu.vector_store %arg4[%c0_15, %c0_16, %c0_17], %23 {strides = array<i32>} : memref<1x2x128xf32, #tpu.memory_space<vmem>>, vector<1x1x128xf32>,
    %24 = arith.mulf %15, %15 : vector<16x128xf32>
    %cst_18 = arith.constant dense<0.000000e+00> : vector<128xf32>
    %25 = vector.multi_reduction <add>, %24, %cst_18 [0] : vector<16x128xf32> to vector<128xf32>
    %26 = vector.shape_cast %25 : vector<128xf32> to vector<1x128xf32>
    %c0_19 = arith.constant 0 : index
    %c1_20 = arith.constant 1 : index
    %c0_21 = arith.constant 0 : index
    %27 = vector.load %arg4[%c0_19, %c1_20, %c0_21] : memref<1x2x128xf32, #tpu.memory_space<vmem>>, vector<1x1x128xf32>
    %28 = vector.shape_cast %27 : vector<1x1x128xf32> to vector<1x128xf32>
    %29 = vector.shape_cast %26 : vector<1x128xf32> to vector<1x1x128xf32>
    tpu.vector_store %arg4[%c0_19, %c1_20, %c0_21], %29 {strides = array<i32>} : memref<1x2x128xf32, #tpu.memory_space<vmem>>, vector<1x1x128xf32>,
    return
  }
  func.func @transform_0(%arg0: i32) -> (i32, i32, i32) {
    %c0_i32 = arith.constant 0 : i32
    %c0_i32_0 = arith.constant 0 : i32
    %c0_i32_1 = arith.constant 0 : i32
    return %arg0, %c0_i32, %c0_i32_0 : i32, i32, i32
  }
  func.func @transform_1(%arg0: i32) -> (i32, i32, i32) {
    %c0_i32 = arith.constant 0 : i32
    %c0_i32_0 = arith.constant 0 : i32
    %c0_i32_1 = arith.constant 0 : i32
    %c0_i32_2 = arith.constant 0 : i32
    return %c0_i32, %c0_i32_0, %c0_i32_1 : i32, i32, i32
  }
  func.func @transform_2(%arg0: i32) -> (i32, i32, i32) {
    %c0_i32 = arith.constant 0 : i32
    %c0_i32_0 = arith.constant 0 : i32
    %c0_i32_1 = arith.constant 0 : i32
    return %arg0, %c0_i32, %c0_i32_0 : i32, i32, i32
  }
  func.func @transform_3(%arg0: i32) -> (i32, i32, i32) {
    %c0_i32 = arith.constant 0 : i32
    %c0_i32_0 = arith.constant 0 : i32
    %c0_i32_1 = arith.constant 0 : i32
    return %arg0, %c0_i32, %c0_i32_0 : i32, i32, i32
  }
}

module attributes {stable_mosaic.version = 11 : i64} {
  func.func @_bn_relu_conv_row_kernel(%arg0: i32, %arg1: memref<1x16x128xf32, #tpu.memory_space<vmem>>, %arg2: memref<1x128xf32, #tpu.memory_space<vmem>>, %arg3: memref<1x128xf32, #tpu.memory_space<vmem>>, %arg4: memref<3x128x128xf32, #tpu.memory_space<vmem>>, %arg5: memref<1x16x128xf32, #tpu.memory_space<vmem>>, %arg6: memref<1x2x128xf32, #tpu.memory_space<vmem>>, %arg7: memref<18x128xf32, #tpu.memory_space<vmem>>) attributes {dimension_semantics = [#tpu.dimension_semantics<parallel>], iteration_bounds = array<i64: 2>, scalar_prefetch = 0 : i64, scratch_operands = 1 : i64, tpu.core_type = #tpu.core_type<tc>, window_params = [{transform_indices = @transform_0, window_bounds = array<i64: 1, 16, 128>}, {pipeline_mode = #tpu.pipeline_mode<synchronous>, transform_indices = @transform_1, window_bounds = array<i64: 1, 128>}, {pipeline_mode = #tpu.pipeline_mode<synchronous>, transform_indices = @transform_2, window_bounds = array<i64: 1, 128>}, {pipeline_mode = #tpu.pipeline_mode<synchronous>, transform_indices = @transform_3, window_bounds = array<i64: 3, 128, 128>}, {transform_indices = @transform_4, window_bounds = array<i64: 1, 16, 128>}, {transform_indices = @transform_5, window_bounds = array<i64: 1, 2, 128>}]} {
    %c0 = arith.constant 0 : index
    %c0_0 = arith.constant 0 : index
    %c0_1 = arith.constant 0 : index
    %0 = vector.load %arg1[%c0, %c0_0, %c0_1] : memref<1x16x128xf32, #tpu.memory_space<vmem>>, vector<1x16x128xf32>
    %1 = vector.shape_cast %0 : vector<1x16x128xf32> to vector<16x128xf32>
    %c0_2 = arith.constant 0 : index
    %c0_3 = arith.constant 0 : index
    %2 = vector.load %arg2[%c0_2, %c0_3] : memref<1x128xf32, #tpu.memory_space<vmem>>, vector<1x128xf32>
    %3 = vector.broadcast %2 : vector<1x128xf32> to vector<16x128xf32>
    %4 = arith.mulf %1, %3 : vector<16x128xf32>
    %c0_4 = arith.constant 0 : index
    %c0_5 = arith.constant 0 : index
    %5 = vector.load %arg3[%c0_4, %c0_5] : memref<1x128xf32, #tpu.memory_space<vmem>>, vector<1x128xf32>
    %6 = vector.broadcast %5 : vector<1x128xf32> to vector<16x128xf32>
    %7 = arith.addf %4, %6 : vector<16x128xf32>
    %cst = arith.constant 0.000000e+00 : f32
    %8 = vector.broadcast %cst : f32 to vector<16x128xf32>
    %9 = arith.maximumf %7, %8 : vector<16x128xf32>
    %cst_6 = arith.constant 0.000000e+00 : f32
    %10 = vector.broadcast %cst_6 : f32 to vector<1x128xf32>
    %c0_7 = arith.constant 0 : index
    %c0_8 = arith.constant 0 : index
    %11 = vector.load %arg7[%c0_7, %c0_8] : memref<18x128xf32, #tpu.memory_space<vmem>>, vector<1x128xf32>
    tpu.vector_store %arg7[%c0_7, %c0_8], %10 {strides = array<i32>} : memref<18x128xf32, #tpu.memory_space<vmem>>, vector<1x128xf32>,
    %cst_9 = arith.constant 0.000000e+00 : f32
    %12 = vector.broadcast %cst_9 : f32 to vector<1x128xf32>
    %c17 = arith.constant 17 : index
    %c0_10 = arith.constant 0 : index
    %13 = vector.load %arg7[%c17, %c0_10] : memref<18x128xf32, #tpu.memory_space<vmem>>, vector<1x128xf32>
    tpu.vector_store %arg7[%c17, %c0_10], %12 {strides = array<i32>} : memref<18x128xf32, #tpu.memory_space<vmem>>, vector<1x128xf32>,
    %c1 = arith.constant 1 : index
    %c0_11 = arith.constant 0 : index
    %14 = vector.load %arg7[%c1, %c0_11] : memref<18x128xf32, #tpu.memory_space<vmem>>, vector<16x128xf32>
    tpu.vector_store %arg7[%c1, %c0_11], %9 {strides = array<i32>} : memref<18x128xf32, #tpu.memory_space<vmem>>, vector<16x128xf32>,
    %c0_12 = arith.constant 0 : index
    %c0_13 = arith.constant 0 : index
    %15 = vector.load %arg7[%c0_12, %c0_13] : memref<18x128xf32, #tpu.memory_space<vmem>>, vector<18x128xf32>
    %16 = vector.extract_strided_slice %15 {offsets = [0, 0], sizes = [16, 128], strides = [1, 1]} : vector<18x128xf32> to vector<16x128xf32>
    %c0_14 = arith.constant 0 : index
    %c0_15 = arith.constant 0 : index
    %c0_16 = arith.constant 0 : index
    %17 = vector.load %arg4[%c0_14, %c0_15, %c0_16] : memref<3x128x128xf32, #tpu.memory_space<vmem>>, vector<1x128x128xf32>
    %18 = vector.shape_cast %17 : vector<1x128x128xf32> to vector<128x128xf32>
    %cst_17 = arith.constant dense<0.000000e+00> : vector<16x128xf32>
    %19 = tpu.matmul %16, %18, %cst_17 {dimension_numbers = #tpu.dot_dimension_numbers<[1], [0], [0], [1], [0, 0, 1, 1], [], []>} : vector<16x128xf32>, vector<128x128xf32>, vector<16x128xf32> -> vector<16x128xf32>
    %20 = vector.extract_strided_slice %15 {offsets = [1, 0], sizes = [16, 128], strides = [1, 1]} : vector<18x128xf32> to vector<16x128xf32>
    %c1_18 = arith.constant 1 : index
    %c0_19 = arith.constant 0 : index
    %c0_20 = arith.constant 0 : index
    %21 = vector.load %arg4[%c1_18, %c0_19, %c0_20] : memref<3x128x128xf32, #tpu.memory_space<vmem>>, vector<1x128x128xf32>
    %22 = vector.shape_cast %21 : vector<1x128x128xf32> to vector<128x128xf32>
    %cst_21 = arith.constant dense<0.000000e+00> : vector<16x128xf32>
    %23 = tpu.matmul %20, %22, %cst_21 {dimension_numbers = #tpu.dot_dimension_numbers<[1], [0], [0], [1], [0, 0, 1, 1], [], []>} : vector<16x128xf32>, vector<128x128xf32>, vector<16x128xf32> -> vector<16x128xf32>
    %24 = arith.addf %19, %23 : vector<16x128xf32>
    %25 = vector.extract_strided_slice %15 {offsets = [2, 0], sizes = [16, 128], strides = [1, 1]} : vector<18x128xf32> to vector<16x128xf32>
    %c2 = arith.constant 2 : index
    %c0_22 = arith.constant 0 : index
    %c0_23 = arith.constant 0 : index
    %26 = vector.load %arg4[%c2, %c0_22, %c0_23] : memref<3x128x128xf32, #tpu.memory_space<vmem>>, vector<1x128x128xf32>
    %27 = vector.shape_cast %26 : vector<1x128x128xf32> to vector<128x128xf32>
    %cst_24 = arith.constant dense<0.000000e+00> : vector<16x128xf32>
    %28 = tpu.matmul %25, %27, %cst_24 {dimension_numbers = #tpu.dot_dimension_numbers<[1], [0], [0], [1], [0, 0, 1, 1], [], []>} : vector<16x128xf32>, vector<128x128xf32>, vector<16x128xf32> -> vector<16x128xf32>
    %29 = arith.addf %24, %28 : vector<16x128xf32>
    %c0_25 = arith.constant 0 : index
    %c0_26 = arith.constant 0 : index
    %c0_27 = arith.constant 0 : index
    %30 = vector.load %arg5[%c0_25, %c0_26, %c0_27] : memref<1x16x128xf32, #tpu.memory_space<vmem>>, vector<1x16x128xf32>
    %31 = vector.shape_cast %30 : vector<1x16x128xf32> to vector<16x128xf32>
    %32 = vector.shape_cast %29 : vector<16x128xf32> to vector<1x16x128xf32>
    tpu.vector_store %arg5[%c0_25, %c0_26, %c0_27], %32 {strides = array<i32>} : memref<1x16x128xf32, #tpu.memory_space<vmem>>, vector<1x16x128xf32>,
    %cst_28 = arith.constant dense<0.000000e+00> : vector<128xf32>
    %33 = vector.multi_reduction <add>, %29, %cst_28 [0] : vector<16x128xf32> to vector<128xf32>
    %34 = vector.shape_cast %33 : vector<128xf32> to vector<1x128xf32>
    %c0_29 = arith.constant 0 : index
    %c0_30 = arith.constant 0 : index
    %c0_31 = arith.constant 0 : index
    %35 = vector.load %arg6[%c0_29, %c0_30, %c0_31] : memref<1x2x128xf32, #tpu.memory_space<vmem>>, vector<1x1x128xf32>
    %36 = vector.shape_cast %35 : vector<1x1x128xf32> to vector<1x128xf32>
    %37 = vector.shape_cast %34 : vector<1x128xf32> to vector<1x1x128xf32>
    tpu.vector_store %arg6[%c0_29, %c0_30, %c0_31], %37 {strides = array<i32>} : memref<1x2x128xf32, #tpu.memory_space<vmem>>, vector<1x1x128xf32>,
    %38 = arith.mulf %29, %29 : vector<16x128xf32>
    %cst_32 = arith.constant dense<0.000000e+00> : vector<128xf32>
    %39 = vector.multi_reduction <add>, %38, %cst_32 [0] : vector<16x128xf32> to vector<128xf32>
    %40 = vector.shape_cast %39 : vector<128xf32> to vector<1x128xf32>
    %c0_33 = arith.constant 0 : index
    %c1_34 = arith.constant 1 : index
    %c0_35 = arith.constant 0 : index
    %41 = vector.load %arg6[%c0_33, %c1_34, %c0_35] : memref<1x2x128xf32, #tpu.memory_space<vmem>>, vector<1x1x128xf32>
    %42 = vector.shape_cast %41 : vector<1x1x128xf32> to vector<1x128xf32>
    %43 = vector.shape_cast %40 : vector<1x128xf32> to vector<1x1x128xf32>
    tpu.vector_store %arg6[%c0_33, %c1_34, %c0_35], %43 {strides = array<i32>} : memref<1x2x128xf32, #tpu.memory_space<vmem>>, vector<1x1x128xf32>,
    return
  }
  func.func @transform_0(%arg0: i32) -> (i32, i32, i32) {
    %c0_i32 = arith.constant 0 : i32
    %c0_i32_0 = arith.constant 0 : i32
    %c0_i32_1 = arith.constant 0 : i32
    return %arg0, %c0_i32, %c0_i32_0 : i32, i32, i32
  }
  func.func @transform_1(%arg0: i32) -> (i32, i32) {
    %c0_i32 = arith.constant 0 : i32
    %c0_i32_0 = arith.constant 0 : i32
    %c0_i32_1 = arith.constant 0 : i32
    return %c0_i32, %c0_i32_0 : i32, i32
  }
  func.func @transform_2(%arg0: i32) -> (i32, i32) {
    %c0_i32 = arith.constant 0 : i32
    %c0_i32_0 = arith.constant 0 : i32
    %c0_i32_1 = arith.constant 0 : i32
    return %c0_i32, %c0_i32_0 : i32, i32
  }
  func.func @transform_3(%arg0: i32) -> (i32, i32, i32) {
    %c0_i32 = arith.constant 0 : i32
    %c0_i32_0 = arith.constant 0 : i32
    %c0_i32_1 = arith.constant 0 : i32
    %c0_i32_2 = arith.constant 0 : i32
    return %c0_i32, %c0_i32_0, %c0_i32_1 : i32, i32, i32
  }
  func.func @transform_4(%arg0: i32) -> (i32, i32, i32) {
    %c0_i32 = arith.constant 0 : i32
    %c0_i32_0 = arith.constant 0 : i32
    %c0_i32_1 = arith.constant 0 : i32
    return %arg0, %c0_i32, %c0_i32_0 : i32, i32, i32
  }
  func.func @transform_5(%arg0: i32) -> (i32, i32, i32) {
    %c0_i32 = arith.constant 0 : i32
    %c0_i32_0 = arith.constant 0 : i32
    %c0_i32_1 = arith.constant 0 : i32
    return %arg0, %c0_i32, %c0_i32_0 : i32, i32, i32
  }
}

module attributes {stable_mosaic.version = 11 : i64} {
  func.func @_bn_add_relu_kernel(%arg0: i32, %arg1: memref<1x16x128xf32, #tpu.memory_space<vmem>>, %arg2: memref<1x16x128xf32, #tpu.memory_space<vmem>>, %arg3: memref<1x128xf32, #tpu.memory_space<vmem>>, %arg4: memref<1x128xf32, #tpu.memory_space<vmem>>, %arg5: memref<1x16x128xf32, #tpu.memory_space<vmem>>) attributes {dimension_semantics = [#tpu.dimension_semantics<parallel>], iteration_bounds = array<i64: 2>, scalar_prefetch = 0 : i64, scratch_operands = 0 : i64, tpu.core_type = #tpu.core_type<tc>, window_params = [{transform_indices = @transform_0, window_bounds = array<i64: 1, 16, 128>}, {transform_indices = @transform_1, window_bounds = array<i64: 1, 16, 128>}, {pipeline_mode = #tpu.pipeline_mode<synchronous>, transform_indices = @transform_2, window_bounds = array<i64: 1, 128>}, {pipeline_mode = #tpu.pipeline_mode<synchronous>, transform_indices = @transform_3, window_bounds = array<i64: 1, 128>}, {transform_indices = @transform_4, window_bounds = array<i64: 1, 16, 128>}]} {
    %c0 = arith.constant 0 : index
    %c0_0 = arith.constant 0 : index
    %c0_1 = arith.constant 0 : index
    %0 = vector.load %arg1[%c0, %c0_0, %c0_1] : memref<1x16x128xf32, #tpu.memory_space<vmem>>, vector<1x16x128xf32>
    %1 = vector.shape_cast %0 : vector<1x16x128xf32> to vector<16x128xf32>
    %c0_2 = arith.constant 0 : index
    %c0_3 = arith.constant 0 : index
    %2 = vector.load %arg3[%c0_2, %c0_3] : memref<1x128xf32, #tpu.memory_space<vmem>>, vector<1x128xf32>
    %3 = vector.broadcast %2 : vector<1x128xf32> to vector<16x128xf32>
    %4 = arith.mulf %1, %3 : vector<16x128xf32>
    %c0_4 = arith.constant 0 : index
    %c0_5 = arith.constant 0 : index
    %5 = vector.load %arg4[%c0_4, %c0_5] : memref<1x128xf32, #tpu.memory_space<vmem>>, vector<1x128xf32>
    %6 = vector.broadcast %5 : vector<1x128xf32> to vector<16x128xf32>
    %7 = arith.addf %4, %6 : vector<16x128xf32>
    %c0_6 = arith.constant 0 : index
    %c0_7 = arith.constant 0 : index
    %c0_8 = arith.constant 0 : index
    %8 = vector.load %arg2[%c0_6, %c0_7, %c0_8] : memref<1x16x128xf32, #tpu.memory_space<vmem>>, vector<1x16x128xf32>
    %9 = vector.shape_cast %8 : vector<1x16x128xf32> to vector<16x128xf32>
    %10 = arith.addf %7, %9 : vector<16x128xf32>
    %cst = arith.constant 0.000000e+00 : f32
    %11 = vector.broadcast %cst : f32 to vector<16x128xf32>
    %12 = arith.maximumf %10, %11 : vector<16x128xf32>
    %c0_9 = arith.constant 0 : index
    %c0_10 = arith.constant 0 : index
    %c0_11 = arith.constant 0 : index
    %13 = vector.load %arg5[%c0_9, %c0_10, %c0_11] : memref<1x16x128xf32, #tpu.memory_space<vmem>>, vector<1x16x128xf32>
    %14 = vector.shape_cast %13 : vector<1x16x128xf32> to vector<16x128xf32>
    %15 = vector.shape_cast %12 : vector<16x128xf32> to vector<1x16x128xf32>
    tpu.vector_store %arg5[%c0_9, %c0_10, %c0_11], %15 {strides = array<i32>} : memref<1x16x128xf32, #tpu.memory_space<vmem>>, vector<1x16x128xf32>,
    return
  }
  func.func @transform_0(%arg0: i32) -> (i32, i32, i32) {
    %c0_i32 = arith.constant 0 : i32
    %c0_i32_0 = arith.constant 0 : i32
    %c0_i32_1 = arith.constant 0 : i32
    return %arg0, %c0_i32, %c0_i32_0 : i32, i32, i32
  }
  func.func @transform_1(%arg0: i32) -> (i32, i32, i32) {
    %c0_i32 = arith.constant 0 : i32
    %c0_i32_0 = arith.constant 0 : i32
    %c0_i32_1 = arith.constant 0 : i32
    return %arg0, %c0_i32, %c0_i32_0 : i32, i32, i32
  }
  func.func @transform_2(%arg0: i32) -> (i32, i32) {
    %c0_i32 = arith.constant 0 : i32
    %c0_i32_0 = arith.constant 0 : i32
    %c0_i32_1 = arith.constant 0 : i32
    return %c0_i32, %c0_i32_0 : i32, i32
  }
  func.func @transform_3(%arg0: i32) -> (i32, i32) {
    %c0_i32 = arith.constant 0 : i32
    %c0_i32_0 = arith.constant 0 : i32
    %c0_i32_1 = arith.constant 0 : i32
    return %c0_i32, %c0_i32_0 : i32, i32
  }
  func.func @transform_4(%arg0: i32) -> (i32, i32, i32) {
    %c0_i32 = arith.constant 0 : i32
    %c0_i32_0 = arith.constant 0 : i32
    %c0_i32_1 = arith.constant 0 : i32
    return %arg0, %c0_i32, %c0_i32_0 : i32, i32, i32
  }
}

</mosaic_0001>

<bundles_post_ra>
// kernel: tile.23
= control target key start
LH: loop header
LB: loop body
LE: loop exit
PB: predicated region body
PF: predicated region fallthrough
CT: control target
= control target key end

     0   :  { %s28_s0 = inlined_call_operand.vmem [shape: f32[8], index: 0, kind: input, shape index: {}]   ;;  %s29_s1 = inlined_call_operand.vmem [shape: f32[16,8], index: 1, kind: output, shape index: {}]  }
   0x1   :  { %v4_v0 = vld [vmem:[%s28_s0] ss:$0 sm:$0xff] }
   0x2   :  { %5 = vst [vmem:[%s29_s1] sm:$0xff] %v4_v0  ;;  %8 = vst [vmem:[%s29_s1 + $0x8] sm:$0xff] %v4_v0 }

// kernel: tile.24
= control target key start
LH: loop header
LB: loop body
LE: loop exit
PB: predicated region body
PF: predicated region fallthrough
CT: control target
= control target key end

     0   :  { %s131_s10 = smov 120   ;;  %s132_s11 = smov 104   ;;  %vm3_vm0 = vcmask 64512   ;;  %vm9_vm1 = vcmask 1048512   ;;  %vm15_vm2 = vcmask 982912   ;;  %vm21_vm3 = vcmask 917312   ;;  %s207_s0 = inlined_call_operand.vmem [shape: f32[16,8], index: 0, kind: input, shape index: {}]   ;;  %s208_s1 = inlined_call_operand.vmem [shape: f32[1,128], index: 1, kind: output, shape index: {}]  }
   0x1   :  { %v101_v0 = vld [vmem:[%s207_s0 + $0xf] sm:$0x1]   ;;  %v103_v1 = vld [vmem:[%s207_s0 + $0xd] sm:$0x1]   ;;  %v102_v2 = vld [vmem:[%s207_s0 + $0xe] sm:$0x1]  }
   0x2   :  { %7 = vrot.lane.b32.xlu0 %v101_v0, %s131_s10  ;;  %19 = vrot.lane.b32.xlu1 %v103_v1, %s132_s11  ;;  %v104_v3 = vld [vmem:[%s207_s0 + $0xc] sm:$0x1]   ;;  %s133_s16 = smov 112   ;;  %s134_s17 = smov 96   ;;  %v105_v4 = vld [vmem:[%s207_s0 + $0xb] sm:$0x1]  }
   0x3   :  { %v106_v5 = vld [vmem:[%s207_s0 + $0xa] sm:$0x1]   ;;  %v2_v6 = vld [vmem:[%s207_s0] sm:$0x1]   ;;  %s135_s24 = smov 88   ;;  %s136_s25 = smov 80  }
   0x4   :  { %4 = vst.msk [vmem:[#allocation0] sm:$0x1] %vm3_vm0, %v2_v6   ;;  %v107_v7 = vld [vmem:[%s207_s0 + $0x9] sm:$0x1]   ;;  %v108_v8 = vld [vmem:[%s207_s0 + $0x8] sm:$0x1]  }
   0x5   :  { %s137_s30 = smov 72   ;;  %s138_s2 = smov 64   ;;  %v109_v9 = vld [vmem:[%s207_s0 + $0x7] sm:$0x1]   ;;  %v110_v10 = vld [vmem:[%s207_s0 + $0x6] sm:$0x1]  }
   0x6   :  { %13 = vrot.lane.b32.xlu0 %v102_v2, %s133_s16  ;;  %25 = vrot.lane.b32.xlu1 %v104_v3, %s134_s17  ;;  %s139_s7 = smov 56   ;;  %s140_s8 = smov 48   ;;  %v111_v11 = vld [vmem:[%s207_s0 + $0x5] sm:$0x1]   ;;  %v112_v12 = vld [vmem:[%s207_s0 + $0x4] sm:$0x1]  }
   0x7   :  { %s141_s13 = smov 40   ;;  %s142_s14 = smov 32   ;;  %v113_v13 = vld [vmem:[%s207_s0 + $0x3] sm:$0x1]   ;;  %v114_v14 = vld [vmem:[%s207_s0 + $0x2] sm:$0x1]  }
   0x8   :  { %s143_s19 = smov 24   ;;  %s144_s20 = smov 16   ;;  %v115_v15 = vld [vmem:[%s207_s0 + $0x1] sm:$0x1]   ;;  %vm27_vm4 = vcmask 851712   ;;  %vm33_vm5 = vcmask 786112  }
   0x9   :  { %s145_s0 = smov 8   ;;  %vm39_vm6 = vcmask 720512   ;;  %vm45_vm7 = vcmask 654912   ;;  %vm51_vm8 = vcmask 589312   ;;  %vm57_vm9 = vcmask 523712  }
   0xa   :  { %31 = vrot.lane.b32.xlu0 %v105_v4, %s135_s24  ;;  %37 = vrot.lane.b32.xlu1 %v106_v5, %s136_s25  ;;  %vm63_vm10 = vcmask 458112   ;;  %vm69_vm11 = vcmask 392512   ;;  %vm75_vm12 = vcmask 326912   ;;  %vm81_vm13 = vcmask 261312  }
   0xb   :  { %vm87_vm14 = vcmask 195712   ;;  %vm93_vm15 = vcmask 130112  }
   0xe   :  { %43 = vrot.lane.b32.xlu0 %v107_v7, %s137_s30  ;;  %49 = vrot.lane.b32.xlu1 %v108_v8, %s138_s2 }
  0x12   :  { %55 = vrot.lane.b32.xlu0 %v109_v9, %s139_s7  ;;  %61 = vrot.lane.b32.xlu1 %v110_v10, %s140_s8 }
  0x16   :  { %67 = vrot.lane.b32.xlu0 %v111_v11, %s141_s13  ;;  %73 = vrot.lane.b32.xlu1 %v112_v12, %s142_s14 }
  0x1a   :  { %79 = vrot.lane.b32.xlu0 %v113_v13, %s143_s19  ;;  %85 = vrot.lane.b32.xlu1 %v114_v14, %s144_s20 }
  0x1e   :  { %91 = vrot.lane.b32.xlu0 %v115_v15, %s145_s0 }
  0x74   :  { %v8_v16 = vpop.permute.xlu0 %7   ;;  %v20_v17 = vpop.permute.xlu1 %19  }
  0x75   :  { %10 = vst.msk [vmem:[#allocation0] sm:$0x1] %vm9_vm1, %v8_v16  }
  0x78   :  { %v14_v18 = vpop.permute.xlu0 %13   ;;  %v26_v19 = vpop.permute.xlu1 %25  }
  0x79   :  { %16 = vst.msk [vmem:[#allocation0] sm:$0x1] %vm15_vm2, %v14_v18  }
  0x7a   :  { %22 = vst.msk [vmem:[#allocation0] sm:$0x1] %vm21_vm3, %v20_v17  }
  0x7b   :  { %28 = vst.msk [vmem:[#allocation0] sm:$0x1] %vm27_vm4, %v26_v19  }
  0x7c   :  { %v32_v20 = vpop.permute.xlu0 %31   ;;  %v38_v21 = vpop.permute.xlu1 %37  }
  0x7d   :  { %34 = vst.msk [vmem:[#allocation0] sm:$0x1] %vm33_vm5, %v32_v20  }
  0x7e   :  { %40 = vst.msk [vmem:[#allocation0] sm:$0x1] %vm39_vm6, %v38_v21  }
  0x80   :  { %v44_v22 = vpop.permute.xlu0 %43   ;;  %v50_v23 = vpop.permute.xlu1 %49  }
  0x81   :  { %46 = vst.msk [vmem:[#allocation0] sm:$0x1] %vm45_vm7, %v44_v22  }
  0x82   :  { %52 = vst.msk [vmem:[#allocation0] sm:$0x1] %vm51_vm8, %v50_v23  }
  0x84   :  { %v56_v24 = vpop.permute.xlu0 %55   ;;  %v62_v25 = vpop.permute.xlu1 %61  }
  0x85   :  { %58 = vst.msk [vmem:[#allocation0] sm:$0x1] %vm57_vm9, %v56_v24  }
  0x86   :  { %64 = vst.msk [vmem:[#allocation0] sm:$0x1] %vm63_vm10, %v62_v25  }
  0x88   :  { %v68_v26 = vpop.permute.xlu0 %67   ;;  %v74_v27 = vpop.permute.xlu1 %73  }
  0x89   :  { %70 = vst.msk [vmem:[#allocation0] sm:$0x1] %vm69_vm11, %v68_v26  }
  0x8a   :  { %76 = vst.msk [vmem:[#allocation0] sm:$0x1] %vm75_vm12, %v74_v27  }
  0x8c   :  { %v80_v28 = vpop.permute.xlu0 %79   ;;  %v86_v29 = vpop.permute.xlu1 %85  }
  0x8d   :  { %82 = vst.msk [vmem:[#allocation0] sm:$0x1] %vm81_vm13, %v80_v28  }
  0x8e   :  { %88 = vst.msk [vmem:[#allocation0] sm:$0x1] %vm87_vm14, %v86_v29  }
  0x90   :  { %v92_v30 = vpop.permute.xlu0 %91  }
  0x91   :  { %94 = vst.msk [vmem:[#allocation0] sm:$0x1] %vm93_vm15, %v92_v30  }
  0x98   :  { %v98_v31 = vld [vmem:[#allocation0] sm:$0x1] }
  0x99   :  { %100 = vst [vmem:[%s208_s1] sm:$0x1] %v98_v31 }

// kernel: residual_block_pallas.5
= control target key start
LH: loop header
LB: loop body
LE: loop exit
PB: predicated region body
PF: predicated region fallthrough
CT: control target
= control target key end

     0   :  { %s372_s15 = smov 0   ;;  %s398_s0 = inlined_call_operand.vmem [shape: f32[2,16,128], index: 0, kind: input, shape index: {}]   ;;  %s399_s1 = inlined_call_operand.vmem [shape: f32[2,16,128], index: 1, kind: input, shape index: {}]   ;;  %s400_s2 = inlined_call_operand.vmem [shape: f32[1,128], index: 2, kind: input, shape index: {}]   ;;  %s401_s3 = inlined_call_operand.vmem [shape: f32[1,128], index: 3, kind: input, shape index: {}]   ;;  %s402_s4 = inlined_call_operand.vmem [shape: f32[2,16,128], index: 4, kind: output, shape index: {}]  }
   0x1 LB: > { %s313_s16 = sadd.s32 4294967295, %s345_s15   ;;  %p317_p0 = scmp.ge.s32.totalorder %s345_s15, 1  ;;  %s345_s15 = sphi %s372_s15, %s14_s15  }
   0x2   : > { %p172_p1 = scmp.lt.s32.totalorder %s345_s15, 3 }
   0x4   : > { %p173_p2 = pnand %p317_p0, %p172_p1 }
   0x5   : > { %p203_p3 = scmp.lt.s32.totalorder (!%p173_p2), %s313_s16, 1  ;;  %v324_v0 = vld [vmem:[%s400_s2] ss:$0 sm:$0xff] (!%p173_p2) }
   0x6   : > { %176 = sbr.rel (%p173_p2) target bundleno = 26 (0x1a), region = 36  ;;  %v325_v3 = vld [vmem:[%s401_s3] ss:$0 sm:$0xff] (!%p173_p2) }
   0xd   : > { %s404_s16 = smov (!%p203_p3, %s313_s16), 1 }
   0xe   : > { %s328_s17 = sshll.u32 %s404_s16, 4 }
   0xf   : > { %s207_s22 = scalar_lea.vmem %s398_s0, %s328_s17  ;;  %s212_s25 = scalar_lea.vmem %s399_s1, %s328_s17 }
  0x10   : > { %v218_v1 = vld [vmem:[%s207_s22] sm:$0xff]  ;;  %v219_v2 = vld [vmem:[%s207_s22 + $0x8] sm:$0xff]  ;;  %s217_s30 = scalar_lea.vmem %s402_s4, %s328_s17 }
  0x11   : > { %v227_v4 = vmul.f32 %v324_v0, %v218_v1  ;;  %v228_v5 = vmul.f32 %v324_v0, %v219_v2  ;;  %v238_v6 = vld [vmem:[%s212_s25] sm:$0xff]  ;;  %v239_v7 = vld [vmem:[%s212_s25 + $0x8] sm:$0xff] }
  0x13   : > { %v236_v8 = vadd.f32 %v325_v3, %v227_v4  ;;  %v237_v9 = vadd.f32 %v325_v3, %v228_v5 }
  0x15   : > { %v240_v10 = vadd.f32 %v238_v6, %v236_v8  ;;  %v241_v11 = vadd.f32 %v239_v7, %v237_v9 }
  0x17   : > { %v242_v12 = vmax.f32 %v240_v10, 0.0  ;;  %v243_v13 = vmax.f32 %v241_v11, 0.0 }
  0x19   : > { %244 = vst [vmem:[%s217_s30] sm:$0xff] %v242_v12  ;;  %245 = vst [vmem:[%s217_s30 + $0x8] sm:$0xff] %v243_v13 }
  0x1a PF: > { %s14_s15 = sadd.s32 1, %s345_s15  }
  0x1b   : > { %p11_p4 = scmp.ge.s32.totalorder %s14_s15, 4  }
  0x1d   :  { %13 = sbr.rel (!%p11_p4) target bundleno = 1 (0x1), region = 69 }

// kernel: residual_block_pallas.3
= control target key start
LH: loop header
LB: loop body
LE: loop exit
PB: predicated region body
PF: predicated region fallthrough
CT: control target
= control target key end

     0   :  { %s927_s12 = smov 0   ;;  %s1119_s0 = inlined_call_operand.vmem [shape: f32[2,18,128], index: 0, kind: input, shape index: {}]   ;;  %s1120_s1 = inlined_call_operand.vmem [shape: f32[3,128,128], index: 1, kind: input, shape index: {}]   ;;  %s1121_s2 = inlined_call_operand.vmem [shape: f32[2,16,128], index: 2, kind: output, shape index: {0}]   ;;  %s1122_s3 = inlined_call_operand.vmem [shape: f32[2,2,128], index: 3, kind: output, shape index: {1}]  }
   0x1 LB: > { %s587_s13 = sadd.s32 4294967295, %s905_s12   ;;  %p591_p0 = scmp.ge.s32.totalorder %s905_s12, 1  ;;  %s905_s12 = sphi %s927_s12, %s14_s12  }
   0x2   : > { %p140_p1 = scmp.lt.s32.totalorder %s905_s12, 3 }
   0x4   : > { %p141_p2 = pnand %p591_p0, %p140_p1 }
   0x5   : > { %v185_v0 = vld [vmem:[%s1120_s1] sm:$0xff] (!%p141_p2)  ;;  %v186_v1 = vld [vmem:[%s1120_s1 + $0x8] sm:$0xff] (!%p141_p2)  ;;  %v187_v2 = vld [vmem:[%s1120_s1 + $0x10] sm:$0xff] (!%p141_p2)  ;;  %p168_p3 = scmp.lt.s32.totalorder (!%p141_p2), %s587_s13, 1  ;;  %vm221_vm0 = vcmask (!%p141_p2), 1046528   ;;  %vm396_vm1 = vcmask (!%p141_p2), 1045504  }
   0x6   : > { %144 = sbr.rel (%p141_p2) target bundleno = 304 (0x130), region = 28  ;;  %v822_v3 = vpack.c.bf16 (!%p141_p2), %v186_v1, %v185_v0  ;;  %v188_v4 = vld [vmem:[%s1120_s1 + $0x18] sm:$0xff] (!%p141_p2)  ;;  %v189_v6 = vld [vmem:[%s1120_s1 + $0x20] sm:$0xff] (!%p141_p2)  ;;  %v190_v7 = vld [vmem:[%s1120_s1 + $0x28] sm:$0xff] (!%p141_p2) }
   0x7   : > { %v826_v5 = vpack.c.bf16 (!%p141_p2), %v188_v4, %v187_v2  ;;  %v830_v8 = vpack.c.bf16 (!%p141_p2), %v190_v7, %v189_v6  ;;  %v596_v9 = vld [vmem:[%s1120_s1 + $0x80] sm:$0xff] (!%p141_p2)  ;;  %v597_v10 = vld [vmem:[%s1120_s1 + $0x88] sm:$0xff] (!%p141_p2)  ;;  %v191_v11 = vld [vmem:[%s1120_s1 + $0x30] sm:$0xff] (!%p141_p2) }
   0x8   : > { %823 = vmatprep.subr.bf16.mxu0 (!%p141_p2), %v822_v3  ;;  %v192_v12 = vld [vmem:[%s1120_s1 + $0x38] sm:$0xff] (!%p141_p2)  ;;  %v790_v13 = vpack.c.bf16 (!%p141_p2), %v597_v10, %v596_v9  ;;  %v598_v14 = vld [vmem:[%s1120_s1 + $0x90] sm:$0xff] (!%p141_p2)  ;;  %v600_v22 = vld [vmem:[%s1120_s1 + $0xa0] sm:$0xff] (!%p141_p2) }
   0x9   : > { %825 = vmatpush3.bf16.msra.mxu0 (!%p141_p2), %v822_v3  ;;  %v599_v19 = vld [vmem:[%s1120_s1 + $0x98] sm:$0xff] (!%p141_p2)  ;;  %v834_v20 = vpack.c.bf16 (!%p141_p2), %v192_v12, %v191_v11  ;;  %v601_v23 = vld [vmem:[%s1120_s1 + $0xa8] sm:$0xff] (!%p141_p2)  ;;  %v193_v24 = vld [vmem:[%s1120_s1 + $0x40] sm:$0xff] (!%p141_p2) }
   0xa   : > { %827 = vmatprep.subr.bf16.mxu0 (!%p141_p2), %v826_v5  ;;  %791 = vmatprep.subr.bf16.mxu1 (!%p141_p2), %v790_v13  ;;  %v794_v21 = vpack.c.bf16 (!%p141_p2), %v599_v19, %v598_v14  ;;  %v194_v25 = vld [vmem:[%s1120_s1 + $0x48] sm:$0xff] (!%p141_p2)  ;;  %v798_v26 = vpack.c.bf16 (!%p141_p2), %v601_v23, %v600_v22  ;;  %v602_v28 = vld [vmem:[%s1120_s1 + $0xb0] sm:$0xff] (!%p141_p2)  ;;  %v603_v29 = vld [vmem:[%s1120_s1 + $0xb8] sm:$0xff] (!%p141_p2) }
   0xb   : > { %793 = vmatpush3.bf16.msra.mxu1 (!%p141_p2), %v790_v13  ;;  %v838_v30 = vpack.c.bf16 (!%p141_p2), %v194_v25, %v193_v24  ;;  %v195_v31 = vld [vmem:[%s1120_s1 + $0x50] sm:$0xff] (!%p141_p2)  ;;  %v196_v32 = vld [vmem:[%s1120_s1 + $0x58] sm:$0xff] (!%p141_p2)  ;;  %v802_v33 = vpack.c.bf16 (!%p141_p2), %v603_v29, %v602_v28  ;;  %v604_v34 = vld [vmem:[%s1120_s1 + $0xc0] sm:$0xff] (!%p141_p2) }
   0xc   : > { %795 = vmatprep.subr.bf16.mxu1 (!%p141_p2), %v794_v21  ;;  %v605_v35 = vld [vmem:[%s1120_s1 + $0xc8] sm:$0xff] (!%p141_p2)  ;;  %v842_v36 = vpack.c.bf16 (!%p141_p2), %v196_v32, %v195_v31  ;;  %v197_v37 = vld [vmem:[%s1120_s1 + $0x60] sm:$0xff] (!%p141_p2)  ;;  %v606_v40 = vld [vmem:[%s1120_s1 + $0xd0] sm:$0xff] (!%p141_p2) }
   0xd   : > { %s1124_s13 = smov (!%p168_p3, %s587_s13), 1  ;;  %829 = vmatpush3.bf16.msra.mxu0 %v826_v5  ;;  %v198_v38 = vld [vmem:[%s1120_s1 + $0x68] sm:$0xff]  ;;  %v806_v39 = vpack.c.bf16 %v605_v35, %v604_v34  ;;  %v607_v41 = vld [vmem:[%s1120_s1 + $0xd8] sm:$0xff]  ;;  %v199_v43 = vld [vmem:[%s1120_s1 + $0x70] sm:$0xff] }
   0xe   : > { %s890_s26 = smul.u32 24, %s1124_s13  ;;  %831 = vmatprep.subr.bf16.mxu0 %v830_v8  ;;  %v846_v42 = vpack.c.bf16 %v198_v38, %v197_v37  ;;  %v200_v44 = vld [vmem:[%s1120_s1 + $0x78] sm:$0xff]  ;;  %v810_v45 = vpack.c.bf16 %v607_v41, %v606_v40  ;;  %v608_v46 = vld [vmem:[%s1120_s1 + $0xe0] sm:$0xff]  ;;  %v609_v47 = vld [vmem:[%s1120_s1 + $0xe8] sm:$0xff]  ;;  %s630_s16 = sshll.u32 %s1124_s13, 4 }
   0xf   : > { %797 = vmatpush3.bf16.msra.mxu1 %v794_v21  ;;  %v850_v48 = vpack.c.bf16 %v200_v44, %v199_v43  ;;  %v612_v49 = vld [vmem:[%s1120_s1 + $0x100] sm:$0xff]  ;;  %v613_v50 = vld [vmem:[%s1120_s1 + $0x108] sm:$0xff]  ;;  %v814_v51 = vpack.c.bf16 %v609_v47, %v608_v46  ;;  %v610_v52 = vld [vmem:[%s1120_s1 + $0xf0] sm:$0xff]  ;;  %s177_s18 = scalar_lea.vmem %s1121_s2, %s630_s16  ;;  %s595_s19 = sshll.u32 %s1124_s13, 1 }
  0x10   : > { %s971_s10 = scalar_lea.vmem %s1119_s0, %s890_s26  ;;  %799 = vmatprep.subr.bf16.mxu1 %v798_v26  ;;  %v611_v53 = vld [vmem:[%s1120_s1 + $0xf8] sm:$0xff]  ;;  %v854_v55 = vpack.c.bf16 %v613_v50, %v612_v49  ;;  %v614_v58 = vld [vmem:[%s1120_s1 + $0x110] sm:$0xff]  ;;  %v616_v0 = vld [vmem:[%s1120_s1 + $0x120] sm:$0xff]  ;;  %s181_s22 = scalar_lea.vmem %s1122_s3, %s595_s19 }
  0x11   : > { %v977_v15 = vld [vmem:[%s971_s10] sm:$0xff]  ;;  %v980_v16 = vld [vmem:[%s971_s10 + $0x8] sm:$0xff]  ;;  %833 = vmatpush3.bf16.msra.mxu0 %v830_v8  ;;  %v184_v57 = vld [vmem:[%s971_s10 + $0x10] sm:$0x3]  ;;  %v818_v60 = vpack.c.bf16 %v611_v53, %v610_v52 }
  0x12   : > { %v222_v17 = vrot.slane %v977_v15, 1  ;;  %v223_v18 = vrot.slane %v980_v16, 1  ;;  %752 = vmatprep.mubr.f32.mxu0 %v977_v15  ;;  %835 = vmatprep.subr.bf16.mxu0 %v834_v20  ;;  %v397_v54 = vrot.slane %v977_v15, 2  ;;  %v398_v56 = vrot.slane %v980_v16, 2  ;;  %v615_v59 = vld [vmem:[%s1120_s1 + $0x118] sm:$0xff]  ;;  %v617_v1 = vld [vmem:[%s1120_s1 + $0x128] sm:$0xff] }
  0x13   : > { %801 = vmatpush3.bf16.msra.mxu1 %v798_v26  ;;  %v858_v61 = vpack.c.bf16 %v615_v59, %v614_v58  ;;  %v225_v62 = vrot.slane %v184_v57, 1  ;;  %v862_v2 = vpack.c.bf16 %v617_v1, %v616_v0  ;;  %v618_v4 = vld [vmem:[%s1120_s1 + $0x130] sm:$0xff]  ;;  %v619_v5 = vld [vmem:[%s1120_s1 + $0x138] sm:$0xff]  ;;  %v620_v7 = vld [vmem:[%s1120_s1 + $0x140] sm:$0xff]  ;;  %v400_v19 = vrot.slane %v184_v57, 2 }
  0x14   : > { %v224_v27 = vsel %vm221_vm0, %v222_v17, %v223_v18  ;;  %803 = vmatprep.subr.bf16.mxu1 %v802_v33  ;;  %v399_v63 = vsel %vm396_vm1, %v397_v54, %v398_v56  ;;  %v866_v6 = vpack.c.bf16 %v619_v5, %v618_v4  ;;  %v621_v8 = vld [vmem:[%s1120_s1 + $0x148] sm:$0xff]  ;;  %v622_v10 = vld [vmem:[%s1120_s1 + $0x150] sm:$0xff]  ;;  %v623_v11 = vld [vmem:[%s1120_s1 + $0x158] sm:$0xff] }
  0x15   : > { %717 = vmatprep.mubr.f32.mxu1 %v224_v27  ;;  %837 = vmatpush3.bf16.msra.mxu0 %v834_v20  ;;  %v226_v3 = vsel %vm221_vm0, %v223_v18, %v225_v62  ;;  %v870_v9 = vpack.c.bf16 %v621_v8, %v620_v7  ;;  %v874_v12 = vpack.c.bf16 %v623_v11, %v622_v10  ;;  %v624_v13 = vld [vmem:[%s1120_s1 + $0x160] sm:$0xff]  ;;  %v625_v14 = vld [vmem:[%s1120_s1 + $0x168] sm:$0xff]  ;;  %v627_v17 = vld [vmem:[%s1120_s1 + $0x178] sm:$0xff] }
  0x16   : > { %839 = vmatprep.subr.bf16.mxu0 %v838_v30  ;;  %v878_v15 = vpack.c.bf16 %v625_v14, %v624_v13  ;;  %v401_v20 = vsel %vm396_vm1, %v398_v56, %v400_v19 }
  0x17   : > { %805 = vmatpush3.bf16.msra.mxu1 %v802_v33 }
  0x18   : > { %807 = vmatprep.subr.bf16.mxu1 %v806_v39 }
  0x19   : > { %841 = vmatpush3.bf16.msra.mxu0 %v838_v30 }
  0x1a   : > { %843 = vmatprep.subr.bf16.mxu0 %v842_v36 }
  0x1b   : > { %809 = vmatpush3.bf16.msra.mxu1 %v806_v39 }
  0x1c   : > { %811 = vmatprep.subr.bf16.mxu1 %v810_v45 }
  0x1d   : > { %845 = vmatpush3.bf16.msra.mxu0 %v842_v36 }
  0x1e   : > { %847 = vmatprep.subr.bf16.mxu0 %v846_v42 }
  0x1f   : > { %813 = vmatpush3.bf16.msra.mxu1 %v810_v45 }
  0x20   : > { %815 = vmatprep.subr.bf16.mxu1 %v814_v51 }
  0x21   : > { %849 = vmatpush3.bf16.msra.mxu0 %v846_v42 }
  0x22   : > { %851 = vmatprep.subr.bf16.mxu0 %v850_v48 }
  0x23   : > { %817 = vmatpush3.bf16.msra.mxu1 %v814_v51 }
  0x24   : > { %819 = vmatprep.subr.bf16.mxu1 %v818_v60 }
  0x25   : > { %853 = vmatpush3.bf16.msra.mxu0 %v850_v48 }
  0x26   : > { %855 = vmatprep.subr.bf16.mxu0 %v854_v55 }
  0x27   : > { %821 = vmatpush3.bf16.msra.mxu1 %v818_v60 }
  0x28   : > { %753 = vmatmul.mubr.f32.vlgmr.msra.gmra.mrb[0].mxu0 %v980_v16  ;;  %v626_v16 = vld [vmem:[%s1120_s1 + $0x170] sm:$0xff] }
  0x29   : > { %857 = vmatpush3.bf16.msra.mxu0 %v854_v55  ;;  %787 = vmatprep.mubr.f32.mxu0 %v399_v63  ;;  %v882_v18 = vpack.c.bf16 %v627_v17, %v626_v16 }
  0x2a   : > { %859 = vmatprep.subr.bf16.mxu0 %v858_v61  ;;  %718 = vmatmul.mubr.f32.vlgmr.msra.gmra.mrb[0].mxu1 %v226_v3 }
  0x2d   : > { %861 = vmatpush3.bf16.msra.mxu0 %v858_v61 }
  0x2e   : > { %863 = vmatprep.subr.bf16.mxu0 %v862_v2 }
  0x31   : > { %865 = vmatpush3.bf16.msra.mxu0 %v862_v2 }
  0x32   : > { %867 = vmatprep.subr.bf16.mxu0 %v866_v6 }
  0x35   : > { %869 = vmatpush3.bf16.msra.mxu0 %v866_v6 }
  0x36   : > { %871 = vmatprep.subr.bf16.mxu0 %v870_v9 }
  0x39   : > { %873 = vmatpush3.bf16.msra.mxu0 %v870_v9 }
  0x3a   : > { %875 = vmatprep.subr.bf16.mxu0 %v874_v12 }
  0x3d   : > { %877 = vmatpush3.bf16.msra.mxu0 %v874_v12 }
  0x3e   : > { %879 = vmatprep.subr.bf16.mxu0 %v878_v15 }
  0x41   : > { %881 = vmatpush3.bf16.msra.mxu0 %v878_v15 }
  0x42   : > { %883 = vmatprep.subr.bf16.mxu0 %v882_v18 }
  0x45   : > { %885 = vmatpush3.bf16.msra.mxu0 %v882_v18 }
  0x48   : > { %788 = vmatmul.mubr.f32.vlgmr.msra.gmra.mrb[0].mxu0 %v401_v20 }
  0xfd   : > { %v719_v21 = vpop.f32.mrb[0].mxu1 }
  0xfe   : > { %v295_v22 = vpop.f32.mrb[1].mxu1 }
 0x11b   : > { %v789_v23 = vpop.f32.mrb[0].mxu0 }
 0x11c   : > { %v886_v24 = vadd.f32 %v789_v23, %v719_v21  ;;  %v470_v25 = vpop.f32.mrb[1].mxu0 }
 0x11d   : > { %v887_v26 = vadd.f32 %v470_v25, %v295_v22 }
 0x11e   : > { %482 = vst [vmem:[%s177_s18 + $0x8] sm:$0xff] %v886_v24  ;;  %v492_v27 = vmul.f32 %v886_v24, %v886_v24 }
 0x11f   : > { %481 = vst [vmem:[%s177_s18] sm:$0xff] %v887_v26  ;;  %v483_v28 = vadd.f32 %v887_v26, %v886_v24  ;;  %v491_v29 = vmul.f32 %v887_v26, %v887_v26 }
 0x121   : > { %v484_v30 = vrot.slane %v483_v28, 4  ;;  %v493_v31 = vadd.f32 %v492_v27, %v491_v29 }
 0x123   : > { %v485_v32 = vadd.f32 %v484_v30, %v483_v28  ;;  %v494_v33 = vrot.slane %v493_v31, 4 }
 0x125   : > { %v486_v34 = vrot.slane %v485_v32, 2  ;;  %v495_v35 = vadd.f32 %v494_v33, %v493_v31 }
 0x127   : > { %v487_v36 = vadd.f32 %v486_v34, %v485_v32  ;;  %v496_v37 = vrot.slane %v495_v35, 2 }
 0x129   : > { %v488_v38 = vrot.slane %v487_v36, 1  ;;  %v497_v39 = vadd.f32 %v496_v37, %v495_v35 }
 0x12b   : > { %v489_v40 = vadd.f32 %v488_v38, %v487_v36  ;;  %v498_v41 = vrot.slane %v497_v39, 1 }
 0x12d   : > { %490 = vst [vmem:[%s181_s22] sm:$0x1] %v489_v40  ;;  %v499_v42 = vadd.f32 %v498_v41, %v497_v39 }
 0x12f   : > { %500 = vst [vmem:[%s181_s22 + $0x1] sm:$0x1] %v499_v42 }
 0x130 PF: > { %s14_s12 = sadd.s32 1, %s905_s12  }
 0x131   : > { %p11_p4 = scmp.ge.s32.totalorder %s14_s12, 4  }
 0x133   :  { %13 = sbr.rel (!%p11_p4) target bundleno = 1 (0x1), region = 72 }

// kernel: residual_block_pallas.4
= control target key start
LH: loop header
LB: loop body
LE: loop exit
PB: predicated region body
PF: predicated region fallthrough
CT: control target
= control target key end

     0   :  { %s1022_s18 = smov 0   ;;  %s1209_s0 = inlined_call_operand.vmem [shape: f32[2,16,128], index: 0, kind: input, shape index: {}]   ;;  %s1210_s1 = inlined_call_operand.vmem [shape: f32[1,128], index: 1, kind: input, shape index: {}]   ;;  %s1211_s2 = inlined_call_operand.vmem [shape: f32[1,128], index: 2, kind: input, shape index: {}]   ;;  %s1212_s3 = inlined_call_operand.vmem [shape: f32[3,128,128], index: 3, kind: input, shape index: {}]   ;;  %s1213_s4 = inlined_call_operand.vmem [shape: f32[2,16,128], index: 4, kind: output, shape index: {0}]   ;;  %s1214_s5 = inlined_call_operand.vmem [shape: f32[2,2,128], index: 5, kind: output, shape index: {1}]  }
   0x1 LB: > { %s667_s19 = sadd.s32 4294967295, %s989_s18   ;;  %p671_p0 = scmp.ge.s32.totalorder %s989_s18, 1  ;;  %s989_s18 = sphi %s1022_s18, %s16_s18  }
   0x2   : > { %p190_p1 = scmp.lt.s32.totalorder %s989_s18, 3 }
   0x4   : > { %p191_p2 = pnand %p671_p0, %p190_p1 }
   0x5   : > { %v265_v0 = vld [vmem:[%s1212_s3] sm:$0xff] (!%p191_p2)  ;;  %v266_v1 = vld [vmem:[%s1212_s3 + $0x8] sm:$0xff] (!%p191_p2)  ;;  %v267_v2 = vld [vmem:[%s1212_s3 + $0x10] sm:$0xff] (!%p191_p2)  ;;  %p222_p3 = scmp.lt.s32.totalorder (!%p191_p2), %s667_s19, 1  ;;  %v991_v5 = vmov (!%p191_p2), 0.0   ;;  %vm301_vm0 = vcmask (!%p191_p2), 1046528  }
   0x6   : > { %194 = sbr.rel (%p191_p2) target bundleno = 304 (0x130), region = 36  ;;  %v906_v3 = vpack.c.bf16 (!%p191_p2), %v266_v1, %v265_v0  ;;  %v268_v4 = vld [vmem:[%s1212_s3 + $0x18] sm:$0xff] (!%p191_p2)  ;;  %258 = vst [vmem:[#allocation2] sm:$0x1] (!%p191_p2), %v991_v5  ;;  %259 = vst [vmem:[#allocation2 + $0x11] sm:$0x1] (!%p191_p2), %v991_v5 }
   0x7   : > { %v910_v6 = vpack.c.bf16 (!%p191_p2), %v268_v4, %v267_v2  ;;  %v269_v7 = vld [vmem:[%s1212_s3 + $0x20] sm:$0xff] (!%p191_p2)  ;;  %v270_v8 = vld [vmem:[%s1212_s3 + $0x28] sm:$0xff] (!%p191_p2)  ;;  %v271_v9 = vld [vmem:[%s1212_s3 + $0x30] sm:$0xff] (!%p191_p2)  ;;  %vm476_vm1 = vcmask (!%p191_p2), 1045504  }
   0x8   : > { %907 = vmatprep.subr.bf16.mxu0 (!%p191_p2), %v906_v3  ;;  %v914_v10 = vpack.c.bf16 (!%p191_p2), %v270_v8, %v269_v7  ;;  %v272_v11 = vld [vmem:[%s1212_s3 + $0x38] sm:$0xff] (!%p191_p2)  ;;  %v679_v12 = vld [vmem:[%s1212_s3 + $0x80] sm:$0xff] (!%p191_p2)  ;;  %v680_v13 = vld [vmem:[%s1212_s3 + $0x88] sm:$0xff] (!%p191_p2) }
   0x9   : > { %909 = vmatpush3.bf16.msra.mxu0 (!%p191_p2), %v906_v3  ;;  %v874_v14 = vpack.c.bf16 (!%p191_p2), %v680_v13, %v679_v12  ;;  %v677_v16 = vld [vmem:[%s1210_s1] ss:$0 sm:$0xff] (!%p191_p2)  ;;  %v681_v21 = vld [vmem:[%s1212_s3 + $0x90] sm:$0xff] (!%p191_p2)  ;;  %v682_v22 = vld [vmem:[%s1212_s3 + $0x98] sm:$0xff] (!%p191_p2)  ;;  %v918_v23 = vpack.c.bf16 (!%p191_p2), %v272_v11, %v271_v9 }
   0xa   : > { %911 = vmatprep.subr.bf16.mxu0 (!%p191_p2), %v910_v6  ;;  %v678_v17 = vld [vmem:[%s1211_s2] ss:$0 sm:$0xff] (!%p191_p2)  ;;  %v878_v25 = vpack.c.bf16 (!%p191_p2), %v682_v22, %v681_v21  ;;  %v684_v27 = vld [vmem:[%s1212_s3 + $0xa8] sm:$0xff] (!%p191_p2)  ;;  %v685_v33 = vld [vmem:[%s1212_s3 + $0xb0] sm:$0xff] (!%p191_p2) }
   0xb   : > { %875 = vmatprep.subr.bf16.mxu1 (!%p191_p2), %v874_v14  ;;  %v683_v26 = vld [vmem:[%s1212_s3 + $0xa0] sm:$0xff] (!%p191_p2)  ;;  %v274_v29 = vld [vmem:[%s1212_s3 + $0x48] sm:$0xff] (!%p191_p2)  ;;  %v686_v34 = vld [vmem:[%s1212_s3 + $0xb8] sm:$0xff] (!%p191_p2) }
   0xc   : > { %877 = vmatpush3.bf16.msra.mxu1 (!%p191_p2), %v874_v14  ;;  %v273_v28 = vld [vmem:[%s1212_s3 + $0x40] sm:$0xff] (!%p191_p2)  ;;  %v882_v31 = vpack.c.bf16 (!%p191_p2), %v684_v27, %v683_v26  ;;  %v275_v37 = vld [vmem:[%s1212_s3 + $0x50] sm:$0xff] (!%p191_p2)  ;;  %v276_v38 = vld [vmem:[%s1212_s3 + $0x58] sm:$0xff] (!%p191_p2)  ;;  %v886_v39 = vpack.c.bf16 (!%p191_p2), %v686_v34, %v685_v33 }
   0xd   : > { %s1216_s19 = smov (!%p222_p3, %s667_s19), 1  ;;  %913 = vmatpush3.bf16.msra.mxu0 %v910_v6  ;;  %879 = vmatprep.subr.bf16.mxu1 %v878_v25  ;;  %v922_v36 = vpack.c.bf16 %v274_v29, %v273_v28  ;;  %v687_v40 = vld [vmem:[%s1212_s3 + $0xc0] sm:$0xff]  ;;  %v688_v41 = vld [vmem:[%s1212_s3 + $0xc8] sm:$0xff]  ;;  %v926_v42 = vpack.c.bf16 %v276_v38, %v275_v37  ;;  %v689_v47 = vld [vmem:[%s1212_s3 + $0xd0] sm:$0xff] }
   0xe   : > { %s713_s9 = sshll.u32 %s1216_s19, 4  ;;  %915 = vmatprep.subr.bf16.mxu0 %v914_v10  ;;  %v277_v43 = vld [vmem:[%s1212_s3 + $0x60] sm:$0xff]  ;;  %v278_v44 = vld [vmem:[%s1212_s3 + $0x68] sm:$0xff]  ;;  %v890_v45 = vpack.c.bf16 %v688_v41, %v687_v40  ;;  %v690_v48 = vld [vmem:[%s1212_s3 + $0xd8] sm:$0xff]  ;;  %s676_s14 = sshll.u32 %s1216_s19, 1 }
   0xf   : > { %s226_s20 = scalar_lea.vmem %s1209_s0, %s713_s9  ;;  %v930_v49 = vpack.c.bf16 %v278_v44, %v277_v43  ;;  %v279_v52 = vld [vmem:[%s1212_s3 + $0x70] sm:$0xff]  ;;  %v280_v53 = vld [vmem:[%s1212_s3 + $0x78] sm:$0xff]  ;;  %v894_v55 = vpack.c.bf16 %v690_v48, %v689_v47  ;;  %v691_v56 = vld [vmem:[%s1212_s3 + $0xe0] sm:$0xff]  ;;  %s231_s13 = scalar_lea.vmem %s1213_s4, %s713_s9 }
  0x10   : > { %v236_v15 = vld [vmem:[%s226_s20] sm:$0xff]  ;;  %v237_v19 = vld [vmem:[%s226_s20 + $0x8] sm:$0xff]  ;;  %881 = vmatpush3.bf16.msra.mxu1 %v878_v25  ;;  %v934_v59 = vpack.c.bf16 %v280_v53, %v279_v52  ;;  %v693_v63 = vld [vmem:[%s1212_s3 + $0xf0] sm:$0xff]  ;;  %s235_s16 = scalar_lea.vmem %s1214_s5, %s676_s14 }
  0x11   : > { %v245_v18 = vmul.f32 %v677_v16, %v236_v15  ;;  %v246_v20 = vmul.f32 %v677_v16, %v237_v19  ;;  %917 = vmatpush3.bf16.msra.mxu0 %v914_v10  ;;  %883 = vmatprep.subr.bf16.mxu1 %v882_v31  ;;  %v692_v57 = vld [vmem:[%s1212_s3 + $0xe8] sm:$0xff]  ;;  %v695_v60 = vld [vmem:[%s1212_s3 + $0x100] sm:$0xff]  ;;  %v694_v0 = vld [vmem:[%s1212_s3 + $0xf8] sm:$0xff] }
  0x12   : > { %919 = vmatprep.subr.bf16.mxu0 %v918_v23  ;;  %v696_v61 = vld [vmem:[%s1212_s3 + $0x108] sm:$0xff]  ;;  %v898_v62 = vpack.c.bf16 %v692_v57, %v691_v56  ;;  %v697_v4 = vld [vmem:[%s1212_s3 + $0x110] sm:$0xff]  ;;  %v698_v5 = vld [vmem:[%s1212_s3 + $0x118] sm:$0xff]  ;;  %v902_v6 = vpack.c.bf16 %v694_v0, %v693_v63 }
  0x13   : > { %v254_v24 = vadd.f32 %v678_v17, %v245_v18  ;;  %v255_v30 = vadd.f32 %v678_v17, %v246_v20  ;;  %v938_v2 = vpack.c.bf16 %v696_v61, %v695_v60  ;;  %v942_v8 = vpack.c.bf16 %v698_v5, %v697_v4  ;;  %v699_v10 = vld [vmem:[%s1212_s3 + $0x120] sm:$0xff]  ;;  %v700_v11 = vld [vmem:[%s1212_s3 + $0x128] sm:$0xff]  ;;  %v701_v14 = vld [vmem:[%s1212_s3 + $0x130] sm:$0xff] }
  0x14   : > { %885 = vmatpush3.bf16.msra.mxu1 %v882_v31  ;;  %v946_v13 = vpack.c.bf16 %v700_v11, %v699_v10  ;;  %v702_v15 = vld [vmem:[%s1212_s3 + $0x138] sm:$0xff]  ;;  %v703_v18 = vld [vmem:[%s1212_s3 + $0x140] sm:$0xff]  ;;  %v704_v19 = vld [vmem:[%s1212_s3 + $0x148] sm:$0xff] }
  0x15   : > { %v256_v32 = vmax.f32 %v254_v24, 0.0  ;;  %v257_v35 = vmax.f32 %v255_v30, 0.0  ;;  %921 = vmatpush3.bf16.msra.mxu0 %v918_v23  ;;  %887 = vmatprep.subr.bf16.mxu1 %v886_v39  ;;  %v950_v17 = vpack.c.bf16 %v702_v15, %v701_v14  ;;  %v954_v20 = vpack.c.bf16 %v704_v19, %v703_v18  ;;  %v705_v21 = vld [vmem:[%s1212_s3 + $0x150] sm:$0xff]  ;;  %v706_v22 = vld [vmem:[%s1212_s3 + $0x158] sm:$0xff]  ;;  %v707_v24 = vld [vmem:[%s1212_s3 + $0x160] sm:$0xff] }
  0x16   : > { %923 = vmatprep.subr.bf16.mxu0 %v922_v36  ;;  %v958_v23 = vpack.c.bf16 %v706_v22, %v705_v21  ;;  %v708_v25 = vld [vmem:[%s1212_s3 + $0x168] sm:$0xff]  ;;  %v709_v27 = vld [vmem:[%s1212_s3 + $0x170] sm:$0xff]  ;;  %v710_v28 = vld [vmem:[%s1212_s3 + $0x178] sm:$0xff] }
  0x17   : > { %260 = vst [vmem:[#allocation2 + $0x1] sm:$0xff] %v256_v32  ;;  %261 = vst [vmem:[#allocation2 + $0x9] sm:$0xff] %v257_v35  ;;  %v962_v26 = vpack.c.bf16 %v708_v25, %v707_v24  ;;  %v966_v29 = vpack.c.bf16 %v710_v28, %v709_v27 }
  0x18   : > { %889 = vmatpush3.bf16.msra.mxu1 %v886_v39 }
  0x19   : > { %925 = vmatpush3.bf16.msra.mxu0 %v922_v36  ;;  %891 = vmatprep.subr.bf16.mxu1 %v890_v45 }
  0x1a   : > { %927 = vmatprep.subr.bf16.mxu0 %v926_v42 }
  0x1c   : > { %893 = vmatpush3.bf16.msra.mxu1 %v890_v45 }
  0x1d   : > { %929 = vmatpush3.bf16.msra.mxu0 %v926_v42  ;;  %895 = vmatprep.subr.bf16.mxu1 %v894_v55 }
  0x1e   : > { %v262_v46 = vld [vmem:[#allocation2] sm:$0xff]  ;;  %v1122_v51 = vld [vmem:[#allocation2 + $0x8] sm:$0xff]  ;;  %931 = vmatprep.subr.bf16.mxu0 %v930_v49  ;;  %v264_v7 = vld [vmem:[#allocation2 + $0x10] sm:$0x3] }
  0x1f   : > { %v302_v50 = vrot.slane %v262_v46, 1  ;;  %836 = vmatprep.mubr.f32.mxu0 %v262_v46  ;;  %v303_v54 = vrot.slane %v1122_v51, 1  ;;  %v477_v1 = vrot.slane %v262_v46, 2  ;;  %v478_v3 = vrot.slane %v1122_v51, 2 }
  0x20   : > { %897 = vmatpush3.bf16.msra.mxu1 %v894_v55  ;;  %v305_v12 = vrot.slane %v264_v7, 1  ;;  %v480_v30 = vrot.slane %v264_v7, 2 }
  0x21   : > { %v304_v58 = vsel %vm301_vm0, %v302_v50, %v303_v54  ;;  %933 = vmatpush3.bf16.msra.mxu0 %v930_v49  ;;  %899 = vmatprep.subr.bf16.mxu1 %v898_v62  ;;  %v479_v9 = vsel %vm476_vm1, %v477_v1, %v478_v3 }
  0x22   : > { %801 = vmatprep.mubr.f32.mxu1 %v304_v58  ;;  %935 = vmatprep.subr.bf16.mxu0 %v934_v59  ;;  %v306_v16 = vsel %vm301_vm0, %v303_v54, %v305_v12  ;;  %v481_v31 = vsel %vm476_vm1, %v478_v3, %v480_v30 }
  0x24   : > { %901 = vmatpush3.bf16.msra.mxu1 %v898_v62 }
  0x25   : > { %937 = vmatpush3.bf16.msra.mxu0 %v934_v59  ;;  %903 = vmatprep.subr.bf16.mxu1 %v902_v6 }
  0x26   : > { %939 = vmatprep.subr.bf16.mxu0 %v938_v2 }
  0x28   : > { %837 = vmatmul.mubr.f32.vlgmr.msra.gmra.mrb[0].mxu0 %v1122_v51  ;;  %905 = vmatpush3.bf16.msra.mxu1 %v902_v6 }
  0x29   : > { %941 = vmatpush3.bf16.msra.mxu0 %v938_v2  ;;  %871 = vmatprep.mubr.f32.mxu0 %v479_v9 }
  0x2a   : > { %943 = vmatprep.subr.bf16.mxu0 %v942_v8 }
  0x2b   : > { %802 = vmatmul.mubr.f32.vlgmr.msra.gmra.mrb[0].mxu1 %v306_v16 }
  0x2d   : > { %945 = vmatpush3.bf16.msra.mxu0 %v942_v8 }
  0x2e   : > { %947 = vmatprep.subr.bf16.mxu0 %v946_v13 }
  0x31   : > { %949 = vmatpush3.bf16.msra.mxu0 %v946_v13 }
  0x32   : > { %951 = vmatprep.subr.bf16.mxu0 %v950_v17 }
  0x35   : > { %953 = vmatpush3.bf16.msra.mxu0 %v950_v17 }
  0x36   : > { %955 = vmatprep.subr.bf16.mxu0 %v954_v20 }
  0x39   : > { %957 = vmatpush3.bf16.msra.mxu0 %v954_v20 }
  0x3a   : > { %959 = vmatprep.subr.bf16.mxu0 %v958_v23 }
  0x3d   : > { %961 = vmatpush3.bf16.msra.mxu0 %v958_v23 }
  0x3e   : > { %963 = vmatprep.subr.bf16.mxu0 %v962_v26 }
  0x41   : > { %965 = vmatpush3.bf16.msra.mxu0 %v962_v26 }
  0x42   : > { %967 = vmatprep.subr.bf16.mxu0 %v966_v29 }
  0x45   : > { %969 = vmatpush3.bf16.msra.mxu0 %v966_v29 }
  0x48   : > { %872 = vmatmul.mubr.f32.vlgmr.msra.gmra.mrb[0].mxu0 %v481_v31 }
  0xfe   : > { %v803_v32 = vpop.f32.mrb[0].mxu1 }
  0xff   : > { %v375_v33 = vpop.f32.mrb[1].mxu1 }
 0x11b   : > { %v873_v34 = vpop.f32.mrb[0].mxu0 }
 0x11c   : > { %v970_v35 = vadd.f32 %v873_v34, %v803_v32  ;;  %v550_v36 = vpop.f32.mrb[1].mxu0 }
 0x11d   : > { %v971_v37 = vadd.f32 %v550_v36, %v375_v33 }
 0x11e   : > { %562 = vst [vmem:[%s231_s13 + $0x8] sm:$0xff] %v970_v35  ;;  %v572_v38 = vmul.f32 %v970_v35, %v970_v35 }
 0x11f   : > { %561 = vst [vmem:[%s231_s13] sm:$0xff] %v971_v37  ;;  %v563_v39 = vadd.f32 %v971_v37, %v970_v35  ;;  %v571_v40 = vmul.f32 %v971_v37, %v971_v37 }
 0x121   : > { %v564_v41 = vrot.slane %v563_v39, 4  ;;  %v573_v42 = vadd.f32 %v572_v38, %v571_v40 }
 0x123   : > { %v565_v43 = vadd.f32 %v564_v41, %v563_v39  ;;  %v574_v44 = vrot.slane %v573_v42, 4 }
 0x125   : > { %v566_v45 = vrot.slane %v565_v43, 2  ;;  %v575_v46 = vadd.f32 %v574_v44, %v573_v42 }
 0x127   : > { %v567_v47 = vadd.f32 %v566_v45, %v565_v43  ;;  %v576_v48 = vrot.slane %v575_v46, 2 }
 0x129   : > { %v568_v49 = vrot.slane %v567_v47, 1  ;;  %v577_v50 = vadd.f32 %v576_v48, %v575_v46 }
 0x12b   : > { %v569_v51 = vadd.f32 %v568_v49, %v567_v47  ;;  %v578_v52 = vrot.slane %v577_v50, 1 }
 0x12d   : > { %570 = vst [vmem:[%s235_s16] sm:$0x1] %v569_v51  ;;  %v579_v53 = vadd.f32 %v578_v52, %v577_v50 }
 0x12f   : > { %580 = vst [vmem:[%s235_s16 + $0x1] sm:$0x1] %v579_v53 }
 0x130 PF: > { %s16_s18 = sadd.s32 1, %s989_s18  }
 0x131   : > { %p13_p4 = scmp.ge.s32.totalorder %s16_s18, 4  }
 0x133   :  { %15 = sbr.rel (!%p13_p4) target bundleno = 1 (0x1), region = 80 }

</bundles_post_ra>
